<compile_context>
chip_gen: v6e
topology: v6e:2x2x1
jax: 0.10.0
libtpu: 0.0.40
codegen_flags: <defaults>
</compile_context>

<pallas_src>
import functools

import jax
import jax.numpy as jnp
from jax.experimental import pallas as pl
from jax.experimental.pallas import tpu as pltpu


# ----------------------------------------------------------------------------
# Fused Pallas kernels (one per Eigen_concat_Singular branch)
# ----------------------------------------------------------------------------
def _pool_edges_concat_kernel(pmk_ref, x_ref, o_ref, *, num_blocks, m, d):
    # Eigen_concat_Singular == True.
    # pmk_ref : (B, P*2*M, N) bf16 -- rows interleaved [pm0^T, epm0^T, pm1^T, ...]
    # x_ref   : (B, N, D)     bf16 (D already padded to a multiple of 128)
    # o_ref   : (B, M, P*2*D) f32
    res = jnp.einsum("bkn,bnd->bkd", pmk_ref[...], x_ref[...],
                     preferred_element_type=jnp.float32)     # ONE fused MXU pass
    for blk in range(num_blocks):          # static scatter: sublane block -> lane slice
        o_ref[:, :, blk * d:(blk + 1) * d] = res[:, blk * m:(blk + 1) * m, :]


def _pool_edges_weighted_kernel(pm_ref, epm_ref, x_ref, o_ref, *,
                                num_blocks, m, d, edge_pool_weight):
    # Eigen_concat_Singular == False.
    # pm_ref / epm_ref : (B, P*M, N) bf16 -- pools stacked along the row axis
    # x_ref            : (B, N, D)   bf16
    # o_ref            : (B, M, P*D) f32
    w = jnp.bfloat16(edge_pool_weight)
    pm = pm_ref[...] + w * epm_ref[...]                       # ONE VPU pass (in-kernel)
    res = jnp.einsum("bkn,bnd->bkd", pm, x_ref[...],
                     preferred_element_type=jnp.float32)      # ONE fused MXU pass
    for blk in range(num_blocks):
        o_ref[:, :, blk * d:(blk + 1) * d] = res[:, blk * m:(blk + 1) * m, :]


# ----------------------------------------------------------------------------
# Wrapper: the whole Pool_Edges.forward is ONE pallas_call
# ----------------------------------------------------------------------------
def pool_edges_forward(x, pool_matrices, edge_pool_matrices, *,
                       eigen_concat_singular, edge_pool_weight=0.0):
    """
    x                  : (B, N, D)  node features
    pool_matrices      : (P, B, N, M)
    edge_pool_matrices : (P, B, N, M)
    returns            : (B, M, P * (2*D if eigen_concat_singular else D)) f32
    """
    P, B, N, M = pool_matrices.shape
    D = x.shape[-1]
    LANE = 128
    Dp = ((D + LANE - 1) // LANE) * LANE   # pad feature dim -> unmasked lane-dense stores

    # bf16 operands for the MXU (accumulation stays f32 inside the kernel).
    x16 = x.astype(jnp.bfloat16)
    if Dp != D:
        x16 = jnp.pad(x16, ((0, 0), (0, 0), (0, Dp - D)))

    # NOTE(perf-review #3): the (M,N)-form reshuffle is kept in the wrapper
    # because it fuses with the mandatory stack + bf16 cast into a single
    # cheap XLA op at these sizes; for large N/M express the contraction as
    # 'bnk,bnd->bkd' instead to skip the extra HBM round trip.
    if eigen_concat_singular:
        # Interleave [pm0, epm0, pm1, epm1, ...] along the pooled-node axis,
        # transposed to (M, N): one stacked LHS for one fused contraction.
        stacked = jnp.stack([pool_matrices, edge_pool_matrices], axis=1)   # (P,2,B,N,M)
        stacked = jnp.transpose(stacked, (2, 0, 1, 4, 3))                  # (B,P,2,M,N)
        stacked = stacked.reshape(B, P * 2 * M, N).astype(jnp.bfloat16)
        n_blk = P * 2
        kernel = functools.partial(_pool_edges_concat_kernel,
                                   num_blocks=n_blk, m=M, d=Dp)
        operands = (stacked, x16)
        in_bytes = stacked.size * 2 + x16.size * 2
        flops = 2 * B * (P * 2 * M) * N * Dp
    else:
        pm_t = jnp.transpose(pool_matrices, (1, 0, 3, 2)) \
                  .reshape(B, P * M, N).astype(jnp.bfloat16)               # (B,P*M,N)
        epm_t = jnp.transpose(edge_pool_matrices, (1, 0, 3, 2)) \
                   .reshape(B, P * M, N).astype(jnp.bfloat16)
        n_blk = P
        kernel = functools.partial(_pool_edges_weighted_kernel,
                                   num_blocks=n_blk, m=M, d=Dp,
                                   edge_pool_weight=float(edge_pool_weight))
        operands = (pm_t, epm_t, x16)
        in_bytes = pm_t.size * 2 + epm_t.size * 2 + x16.size * 2
        flops = 2 * B * (P * M) * N * Dp + B * P * M * N

    out_dp = n_blk * Dp
    out_bytes = B * M * out_dp * 4

    vmem = pl.BlockSpec(memory_space=pltpu.MemorySpace.VMEM)
    out = pl.pallas_call(
        kernel,
        out_shape=jax.ShapeDtypeStruct((B, M, out_dp), jnp.float32),
        in_specs=[vmem] * len(operands),
        out_specs=vmem,
        cost_estimate=pl.CostEstimate(flops=int(flops), transcendentals=0,
                                      bytes_accessed=int(in_bytes + out_bytes)),
    )(*operands)

    if Dp != D:  # strip per-block feature padding
        out = out.reshape(B, M, n_blk, Dp)[..., :D].reshape(B, M, n_blk * D)
    return out


# ----------------------------------------------------------------------------
# Main
# ----------------------------------------------------------------------------
if __name__ == "__main__":
    # Small shapes consistent with the module: B graphs, N nodes, M pooled
    # nodes, D node-feature dim, P pooling matrices.
    B, N, M, D = 2, 16, 8, 128
    num_pool = 2
    edge_pool_weight = 0.3

    key = jax.random.PRNGKey(0)
    kx, kp, ke = jax.random.split(key, 3)
    x = jax.random.normal(kx, (B, N, D), jnp.float32)
    pool_mats = jax.random.uniform(kp, (num_pool, B, N, M), jnp.float32)
    edge_pool_mats = jax.random.uniform(ke, (num_pool, B, N, M), jnp.float32)

    # Branch 1: Eigen_concat_Singular = True
    out_concat = jax.block_until_ready(
        pool_edges_forward(x, pool_mats, edge_pool_mats,
                           eigen_concat_singular=True,
                           edge_pool_weight=edge_pool_weight))

    # Branch 2: Eigen_concat_Singular = False
    out_weighted = jax.block_until_ready(
        pool_edges_forward(x, pool_mats, edge_pool_mats,
                           eigen_concat_singular=False,
                           edge_pool_weight=edge_pool_weight))

    # Pure-JAX f32 references mirroring the torch forward exactly.
    def ref_concat():
        outs = []
        for p in range(num_pool):
            pmt = jnp.swapaxes(pool_mats[p], 1, 2)
            epmt = jnp.swapaxes(edge_pool_mats[p], 1, 2)
            outs.append(jnp.concatenate([pmt @ x, epmt @ x], axis=-1))
        return jnp.concatenate(outs, axis=2) if num_pool > 1 else outs[0]

    def ref_weighted():
        outs = []
        for p in range(num_pool):
            pm = pool_mats[p] + edge_pool_weight * edge_pool_mats[p]
            outs.append(jnp.swapaxes(pm, 1, 2) @ x)
        return jnp.concatenate(outs, axis=2) if num_pool > 1 else outs[0]

    assert out_concat.shape == (B, M, num_pool * 2 * D)
    assert out_weighted.shape == (B, M, num_pool * D)
    assert jnp.all(jnp.isfinite(out_concat)) and jnp.all(jnp.isfinite(out_weighted))
    # bf16 MXU operands with f32 accumulation -> loosened tolerance vs f32 reference.
    assert jnp.allclose(out_concat, ref_concat(), atol=5e-2, rtol=2e-2)
    assert jnp.allclose(out_weighted, ref_weighted(), atol=5e-2, rtol=2e-2)
    print("KERNEL_OK")
</pallas_src>

<mosaic_0001>
module attributes {stable_mosaic.version = 11 : i64} {
  func.func @_pool_edges_concat_kernel(%arg0: memref<2x32x16xbf16, #tpu.memory_space<vmem>>, %arg1: memref<2x16x128xbf16, #tpu.memory_space<vmem>>, %arg2: memref<2x8x512xf32, #tpu.memory_space<vmem>>) attributes {dimension_semantics = [], scalar_prefetch = 0 : i64, scratch_operands = 0 : i64, tpu.core_type = #tpu.core_type<tc>} {
    %c0 = arith.constant 0 : index
    %c0_0 = arith.constant 0 : index
    %c0_1 = arith.constant 0 : index
    %0 = vector.load %arg0[%c0, %c0_0, %c0_1] : memref<2x32x16xbf16, #tpu.memory_space<vmem>>, vector<2x32x16xbf16>
    %c0_2 = arith.constant 0 : index
    %c0_3 = arith.constant 0 : index
    %c0_4 = arith.constant 0 : index
    %1 = vector.load %arg1[%c0_2, %c0_3, %c0_4] : memref<2x16x128xbf16, #tpu.memory_space<vmem>>, vector<2x16x128xbf16>
    "tpu.trace_start"() <{level = 10 : i32, message = "bkn,bnd->bkd"}> : () -> ()
    %cst = arith.constant dense<0.000000e+00> : vector<2x32x128xf32>
    %2 = tpu.matmul %0, %1, %cst {dimension_numbers = #tpu.dot_dimension_numbers<[2], [1], [1], [2], [0, 0, 0, 1, 1, 2], [0], [0]>} : vector<2x32x16xbf16>, vector<2x16x128xbf16>, vector<2x32x128xf32> -> vector<2x32x128xf32>
    "tpu.trace_stop"() : () -> ()
    %3 = vector.extract_strided_slice %2 {offsets = [0, 0, 0], sizes = [2, 8, 128], strides = [1, 1, 1]} : vector<2x32x128xf32> to vector<2x8x128xf32>
    %c0_5 = arith.constant 0 : index
    %c0_6 = arith.constant 0 : index
    %c0_7 = arith.constant 0 : index
    %4 = vector.load %arg2[%c0_5, %c0_6, %c0_7] : memref<2x8x512xf32, #tpu.memory_space<vmem>>, vector<2x8x128xf32>
    tpu.vector_store %arg2[%c0_5, %c0_6, %c0_7], %3 {strides = array<i32>} : memref<2x8x512xf32, #tpu.memory_space<vmem>>, vector<2x8x128xf32>,
    %5 = vector.extract_strided_slice %2 {offsets = [0, 8, 0], sizes = [2, 8, 128], strides = [1, 1, 1]} : vector<2x32x128xf32> to vector<2x8x128xf32>
    %c0_8 = arith.constant 0 : index
    %c0_9 = arith.constant 0 : index
    %c128 = arith.constant 128 : index
    %6 = vector.load %arg2[%c0_8, %c0_9, %c128] : memref<2x8x512xf32, #tpu.memory_space<vmem>>, vector<2x8x128xf32>
    tpu.vector_store %arg2[%c0_8, %c0_9, %c128], %5 {strides = array<i32>} : memref<2x8x512xf32, #tpu.memory_space<vmem>>, vector<2x8x128xf32>,
    %7 = vector.extract_strided_slice %2 {offsets = [0, 16, 0], sizes = [2, 8, 128], strides = [1, 1, 1]} : vector<2x32x128xf32> to vector<2x8x128xf32>
    %c0_10 = arith.constant 0 : index
    %c0_11 = arith.constant 0 : index
    %c256 = arith.constant 256 : index
    %8 = vector.load %arg2[%c0_10, %c0_11, %c256] : memref<2x8x512xf32, #tpu.memory_space<vmem>>, vector<2x8x128xf32>
    tpu.vector_store %arg2[%c0_10, %c0_11, %c256], %7 {strides = array<i32>} : memref<2x8x512xf32, #tpu.memory_space<vmem>>, vector<2x8x128xf32>,
    %9 = vector.extract_strided_slice %2 {offsets = [0, 24, 0], sizes = [2, 8, 128], strides = [1, 1, 1]} : vector<2x32x128xf32> to vector<2x8x128xf32>
    %c0_12 = arith.constant 0 : index
    %c0_13 = arith.constant 0 : index
    %c384 = arith.constant 384 : index
    %10 = vector.load %arg2[%c0_12, %c0_13, %c384] : memref<2x8x512xf32, #tpu.memory_space<vmem>>, vector<2x8x128xf32>
    tpu.vector_store %arg2[%c0_12, %c0_13, %c384], %9 {strides = array<i32>} : memref<2x8x512xf32, #tpu.memory_space<vmem>>, vector<2x8x128xf32>,
    return
  }
}

</mosaic_0001>

<bundles_post_ra>
// kernel: tpu_custom_call.1
= control target key start
LH: loop header
LB: loop body
LE: loop exit
PB: predicated region body
PF: predicated region fallthrough
CT: control target
= control target key end

     0   :  { %vm41_vm0 = vcmask 130048   ;;  %s290_s0 = inlined_call_operand.vmem [shape: bf16[2,32,16], index: 0, kind: input, shape index: {}]   ;;  %s291_s1 = inlined_call_operand.vmem [shape: bf16[2,16,128], index: 1, kind: input, shape index: {}]   ;;  %s292_s2 = inlined_call_operand.hbm [shape: f32[2,8,512], index: 2, kind: output, shape index: {}]  }
   0x1   :  { %v223_v0 = vld [vmem:[%s291_s1] sm:$0xff]   ;;  %v224_v1 = vld [vmem:[%s291_s1 + $0x8] sm:$0xff]   ;;  %v226_v3 = vld [vmem:[%s290_s0 + $0x10] sm:$0xff]  }
   0x2   :  { %208 = vmatprep.subr.bf16.mxu0 %v223_v0  ;;  %v225_v2 = vld [vmem:[%s290_s0] sm:$0xff]   ;;  %214 = vmatprep.subr.bf16.mxu1 %v224_v1  ;;  %v227_v4 = vld [vmem:[%s290_s0 + $0x8] sm:$0xff]   ;;  %v228_v5 = vld [vmem:[%s290_s0 + $0x18] sm:$0xff]  }
   0x3   :  { %209 = vmatpush3.bf16.msra.mxu0 %v223_v0  ;;  %215 = vmatpush3.bf16.msra.mxu1 %v224_v1 }
   0x4   :  { %210 = vmatprep.mubr.msk.bf16.mxu0 %vm41_vm0, %v225_v2  ;;  %216 = vmatprep.mubr.msk.bf16.mxu1 %vm41_vm0, %v226_v3 }
   0x6   :  { %211 = vmatmul.mubr.msk.bf16.vlgmr.msra.gmra.mxu0 %vm41_vm0, %v227_v4 }
   0x7   :  { %7 = vsyncpa [#allocation3], 0  ;;  %217 = vmatmul.mubr.msk.bf16.vlgmr.msra.gmra.mxu1 %vm41_vm0, %v228_v5  ;;  %s251_s20 = smov [#allocation2]  }
   0x8   :  { %s181_s21 = sshll.u32 %s251_s20, 4  ;;  %s182_s21 = int_to_ptr.vmem [resolvable:$true] %s181_s21 }
   0x9   :  { %s229_s0 = scalar_lea.vmem %s182_s21, 1024  ;;  %p234_p1 = scmp.lt.s32.totalorder %s182_s21, %s182_s21 }
   0xa   :  { %p230_p0 = scmp.ne.s32.totalorder %s182_s21, %s229_s0  ;;  %p235_p2 = scmp.lt.s32.totalorder %s229_s0, %s229_s0 }
   0xc   :  { %p236_p3 = por %p235_p2, %p234_p1 }
   0xe   :  { %p237_p4 = pnand %p236_p3, %p230_p0 }
  0xc6   :  { %v212_v6 = vpop.f32.mrf.mxu0 }
  0xc7   :  { %172 = vst [vmem:[#allocation2 + $0x10] sm:$0xff] %v212_v6  ;;  %v218_v7 = vpop.f32.mrf.mxu1 }
  0xc8   :  { %173 = vst [vmem:[#allocation2 + $0x30] sm:$0xff] %v218_v7  ;;  %v82_v8 = vpop.f32.mrf.mxu0 }
  0xc9   :  { %168 = vst [vmem:[#allocation2] sm:$0xff] %v82_v8  ;;  %v153_v9 = vpop.f32.mrf.mxu1 }
  0xca   :  { %169 = vst [vmem:[#allocation2 + $0x20] sm:$0xff] %v153_v9  ;;  %v213_v10 = vpop.f32.mrf.mxu0 }
  0xcb   :  { %174 = vst [vmem:[#allocation2 + $0x18] sm:$0xff] %v213_v10  ;;  %v219_v11 = vpop.f32.mrf.mxu1 }
  0xcc   :  { %175 = vst [vmem:[#allocation2 + $0x38] sm:$0xff] %v219_v11  ;;  %v85_v12 = vpop.f32.mrf.mxu0 }
  0xcd   :  { %170 = vst [vmem:[#allocation2 + $0x8] sm:$0xff] %v85_v12  ;;  %v156_v13 = vpop.f32.mrf.mxu1 }
  0xce   :  { %171 = vst [vmem:[#allocation2 + $0x28] sm:$0xff] %v156_v13 }
  0xcf   :  { %240 = shalt.err (!%p237_p4)
}
  0xd0   :  { %s252_s22 = smov 512   ;;  %s253_s23 = smov 32  }
  0xd1   :  { %187 = dma.vmem_to_hbm [thread:$0]  %s182_s21, 1024, %s292_s2, [#allocation3], %s252_s22, %s252_s22, %s253_s23  }
  0xd2   :  { %249 = dma.done.wait [#allocation3], 1024  }
  0xd3   :  { %250 = vsyncadd [#allocation3], 4294966272 }
  0xd4   :  { %191 = vsyncpa [#allocation3], 1 }

</bundles_post_ra>
